<compile_context>
chip_gen: v7x
topology: tpu7x:2x2x1
jax: 0.10.0
libtpu: 0.0.40
codegen_flags: <defaults>
</compile_context>

<pallas_src>
import functools

import jax
import jax.numpy as jnp
from jax.experimental import pallas as pl
from jax.experimental.pallas import tpu as pltpu


def _round_up(a, b):
    return ((a + b - 1) // b) * b


def _softmax_last(v):
    m = jnp.max(v, axis=-1, keepdims=True)
    e = jnp.exp(v - m)
    # EUP reciprocal instead of a VPU divide.
    return e * pl.reciprocal(jnp.sum(e, axis=-1, keepdims=True), approx=True)


def factorized_forward_kernel(
    x_ref,       # (TILE_N, D_in)            flattened NCHW input tile
    w1_ref,      # (D_in, H)                 encoder layer 1
    b1_ref,      # (1, H)
    w2_ref,      # (H, Z)                    encoder layer 2 (latent projection)
    b2_ref,      # (1, Z)
    wh_ref,      # (Z, num_s + num_y)        fused [s | y] classifier heads
    bh_ref,      # (1, num_s + num_y)
    joint_ref,   # (TILE_N, num_s * num_y)   joint probability, lane-dense 2-D
    logits_ref,  # (TILE_N, num_s + num_y)   fused [s_logits | y_logits] slab
    *,
    num_s,
    num_y,
):
    x = x_ref[...]

    # encoder: z = W2 @ relu(W1 @ x + b1) + b2   (MXU matmuls, f32 accumulate)
    h = jnp.dot(x, w1_ref[...], preferred_element_type=jnp.float32) + b1_ref[...]
    h = jnp.maximum(h, 0.0).astype(w2_ref.dtype)
    z = jnp.dot(h, w2_ref[...], preferred_element_type=jnp.float32) + b2_ref[...]

    # fused classifier heads: one matmul for both s and y logits.
    logits = (
        jnp.dot(z.astype(wh_ref.dtype), wh_ref[...], preferred_element_type=jnp.float32)
        + bh_ref[...]
    )
    logits_ref[...] = logits

    s_logits = logits[:, :num_s]
    y_logits = logits[:, num_s:]

    # softmax over class dims + joint p(s, y) = p(s) * p(y), written lane-dense.
    s_probs = _softmax_last(s_logits)
    y_probs = _softmax_last(y_logits)
    for si in range(num_s):  # num_s is small & static
        joint_ref[:, si * num_y:(si + 1) * num_y] = s_probs[:, si:si + 1] * y_probs


@functools.partial(
    jax.jit, static_argnames=("num_s", "num_y", "tile_n", "compute_dtype")
)
def factorized_forward(
    x_nchw, params, *, num_s, num_y, tile_n=256, compute_dtype=jnp.float32
):
    """NCHW -> flatten -> batch-gridded Pallas kernel -> (joint, (s_logits, y_logits))."""
    n = x_nchw.shape[0]
    w1, b1, w2, b2, wy, by, ws, bs = params
    d_in, hid = w1.shape
    z_dim = w2.shape[1]

    x_flat = x_nchw.reshape(n, -1).astype(compute_dtype)
    assert x_flat.shape[1] == d_in

    # Fuse the two classifier heads: [s | y] along the output dim.
    w_heads = jnp.concatenate([ws, wy], axis=1).astype(compute_dtype)
    b_heads = jnp.concatenate([bs, by], axis=1).astype(jnp.float32)
    w1c = w1.astype(compute_dtype)
    w2c = w2.astype(compute_dtype)
    b1c = b1.astype(jnp.float32)
    b2c = b2.astype(jnp.float32)

    # Batch tile: sublane-aligned (multiple of 8), capped at tile_n (MXU-sized).
    tile = min(tile_n, _round_up(n, 8))
    n_pad = _round_up(n, tile)
    if n_pad != n:
        x_flat = jnp.pad(x_flat, ((0, n_pad - n), (0, 0)))  # zero rows: softmax-safe

    n_heads = num_s + num_y
    grid = (n_pad // tile,)

    itemsize = jnp.dtype(compute_dtype).itemsize
    flops = 2 * n_pad * (d_in * hid + hid * z_dim + z_dim * n_heads)
    transcendentals = n_pad * n_heads
    bytes_accessed = (
        n_pad * d_in * itemsize
        + (d_in * hid + hid * z_dim + z_dim * n_heads) * itemsize
        + (hid + z_dim + n_heads) * 4
        + n_pad * (num_s * num_y + n_heads) * 4
    )

    def resident(shape):
        # Weights/biases: full block, same index every grid step -> stay in VMEM.
        return pl.BlockSpec(shape, lambda i: (0, 0))

    joint, logits = pl.pallas_call(
        functools.partial(factorized_forward_kernel, num_s=num_s, num_y=num_y),
        out_shape=(
            jax.ShapeDtypeStruct((n_pad, num_s * num_y), jnp.float32),
            jax.ShapeDtypeStruct((n_pad, n_heads), jnp.float32),
        ),
        grid=grid,
        in_specs=[
            pl.BlockSpec((tile, d_in), lambda i: (i, 0)),  # streamed x tile
            resident(w1c.shape),
            resident(b1c.shape),
            resident(w2c.shape),
            resident(b2c.shape),
            resident(w_heads.shape),
            resident(b_heads.shape),
        ],
        out_specs=(
            pl.BlockSpec((tile, num_s * num_y), lambda i: (i, 0)),
            pl.BlockSpec((tile, n_heads), lambda i: (i, 0)),
        ),
        compiler_params=pltpu.CompilerParams(dimension_semantics=("parallel",)),
        cost_estimate=pl.CostEstimate(
            flops=int(flops),
            transcendentals=int(transcendentals),
            bytes_accessed=int(bytes_accessed),
        ),
    )(x_flat, w1c, b1c, w2c, b2c, w_heads, b_heads)

    joint = joint[:n]
    logits = logits[:n]
    s_logits = logits[:, :num_s]
    y_logits = logits[:, num_s:]
    return joint, (s_logits, y_logits)


def make_params(key, d_in, hid, z_dim, num_y, num_s):
    """Deterministic synthetic parameters (shapes implied by the module)."""
    ks = jax.random.split(key, 8)
    scale = lambda fan_in: 1.0 / jnp.sqrt(jnp.float32(fan_in))
    w1 = jax.random.normal(ks[0], (d_in, hid), jnp.float32) * scale(d_in)
    b1 = jax.random.normal(ks[1], (1, hid), jnp.float32) * 0.01
    w2 = jax.random.normal(ks[2], (hid, z_dim), jnp.float32) * scale(hid)
    b2 = jax.random.normal(ks[3], (1, z_dim), jnp.float32) * 0.01
    wy = jax.random.normal(ks[4], (z_dim, num_y), jnp.float32) * scale(z_dim)
    by = jax.random.normal(ks[5], (1, num_y), jnp.float32) * 0.01
    ws = jax.random.normal(ks[6], (z_dim, num_s), jnp.float32) * scale(z_dim)
    bs = jax.random.normal(ks[7], (1, num_s), jnp.float32) * 0.01
    return (w1, b1, w2, b2, wy, by, ws, bs)


def reference_forward(x_nchw, params, num_s, num_y):
    """Pure-JAX f32 reference for correctness checking."""
    (w1, b1, w2, b2, wy, by, ws, bs) = params
    n = x_nchw.shape[0]
    x = x_nchw.reshape(n, -1)
    h = jnp.maximum(x @ w1 + b1, 0.0)
    z = h @ w2 + b2
    y_logits = z @ wy + by
    s_logits = z @ ws + bs
    y_probs = jax.nn.softmax(y_logits, axis=-1)
    s_probs = jax.nn.softmax(s_logits, axis=-1)
    joint = (s_probs[:, :, None] * y_probs[:, None, :]).reshape(n, num_s * num_y)
    return joint, (s_logits, y_logits)


if __name__ == "__main__":
    # Small shapes consistent with the forward: NCHW image batch.
    N, C, H, W = 2, 4, 16, 16
    D_IN = C * H * W          # 1024
    HID = 32                  # encoder hidden
    Z_DIM = 32                # latent dim
    NUM_Y, NUM_S = 10, 2      # cluster-head sizes

    key = jax.random.PRNGKey(0)
    kx, kp = jax.random.split(key)
    x = jax.random.normal(kx, (N, C, H, W), jnp.float32)
    params = make_params(kp, D_IN, HID, Z_DIM, NUM_Y, NUM_S)

    joint, (s_logits, y_logits) = factorized_forward(x, params, num_s=NUM_S, num_y=NUM_Y)
    jax.block_until_ready((joint, s_logits, y_logits))

    joint_r, (s_r, y_r) = reference_forward(x, params, NUM_S, NUM_Y)
    assert joint.shape == (N, NUM_S * NUM_Y)
    assert s_logits.shape == (N, NUM_S) and y_logits.shape == (N, NUM_Y)
    # logits take no approximate ops -> tight tolerance
    assert jnp.allclose(s_logits, s_r, atol=1e-5)
    assert jnp.allclose(y_logits, y_r, atol=1e-5)
    # joint uses the approx EUP reciprocal in the softmax -> slightly looser
    assert jnp.allclose(joint, joint_r, atol=2e-2)
    assert jnp.allclose(jnp.sum(joint, axis=-1), jnp.ones((N,)), atol=2e-2)

    # bf16 matmul-input path (fast MXU path on v6e/v7x); looser tolerances.
    joint_bf, (s_bf, y_bf) = factorized_forward(
        x, params, num_s=NUM_S, num_y=NUM_Y, compute_dtype=jnp.bfloat16
    )
    jax.block_until_ready((joint_bf, s_bf, y_bf))
    assert jnp.allclose(s_bf, s_r, atol=5e-2)
    assert jnp.allclose(y_bf, y_r, atol=5e-2)
    assert jnp.allclose(joint_bf, joint_r, atol=5e-2)

    print("KERNEL_OK")
</pallas_src>

<mosaic_0001>
module attributes {stable_mosaic.version = 11 : i64} {
  func.func @factorized_forward_kernel(%arg0: i32, %arg1: memref<8x1024xf32, #tpu.memory_space<vmem>>, %arg2: memref<1024x32xf32, #tpu.memory_space<vmem>>, %arg3: memref<1x32xf32, #tpu.memory_space<vmem>>, %arg4: memref<32x32xf32, #tpu.memory_space<vmem>>, %arg5: memref<1x32xf32, #tpu.memory_space<vmem>>, %arg6: memref<32x12xf32, #tpu.memory_space<vmem>>, %arg7: memref<1x12xf32, #tpu.memory_space<vmem>>, %arg8: memref<8x20xf32, #tpu.memory_space<vmem>>, %arg9: memref<8x12xf32, #tpu.memory_space<vmem>>) attributes {dimension_semantics = [#tpu.dimension_semantics<parallel>], iteration_bounds = array<i64: 1>, scalar_prefetch = 0 : i64, scratch_operands = 0 : i64, tpu.core_type = #tpu.core_type<tc>, window_params = [{transform_indices = @transform_0, window_bounds = array<i64: 8, 1024>}, {pipeline_mode = #tpu.pipeline_mode<synchronous>, transform_indices = @transform_1, window_bounds = array<i64: 1024, 32>}, {pipeline_mode = #tpu.pipeline_mode<synchronous>, transform_indices = @transform_2, window_bounds = array<i64: 1, 32>}, {pipeline_mode = #tpu.pipeline_mode<synchronous>, transform_indices = @transform_3, window_bounds = array<i64: 32, 32>}, {pipeline_mode = #tpu.pipeline_mode<synchronous>, transform_indices = @transform_4, window_bounds = array<i64: 1, 32>}, {pipeline_mode = #tpu.pipeline_mode<synchronous>, transform_indices = @transform_5, window_bounds = array<i64: 32, 12>}, {pipeline_mode = #tpu.pipeline_mode<synchronous>, transform_indices = @transform_6, window_bounds = array<i64: 1, 12>}, {transform_indices = @transform_7, window_bounds = array<i64: 8, 20>}, {transform_indices = @transform_8, window_bounds = array<i64: 8, 12>}]} {
    %c0 = arith.constant 0 : index
    %c0_0 = arith.constant 0 : index
    %0 = vector.load %arg1[%c0, %c0_0] : memref<8x1024xf32, #tpu.memory_space<vmem>>, vector<8x1024xf32>
    %c0_1 = arith.constant 0 : index
    %c0_2 = arith.constant 0 : index
    %1 = vector.load %arg2[%c0_1, %c0_2] : memref<1024x32xf32, #tpu.memory_space<vmem>>, vector<1024x32xf32>
    %cst = arith.constant dense<0.000000e+00> : vector<8x32xf32>
    %2 = tpu.matmul %0, %1, %cst {dimension_numbers = #tpu.dot_dimension_numbers<[1], [0], [0], [1], [0, 0, 1, 1], [], []>} : vector<8x1024xf32>, vector<1024x32xf32>, vector<8x32xf32> -> vector<8x32xf32>
    %c0_3 = arith.constant 0 : index
    %c0_4 = arith.constant 0 : index
    %3 = vector.load %arg3[%c0_3, %c0_4] : memref<1x32xf32, #tpu.memory_space<vmem>>, vector<1x32xf32>
    %4 = vector.broadcast %3 : vector<1x32xf32> to vector<8x32xf32>
    %5 = arith.addf %2, %4 : vector<8x32xf32>
    %cst_5 = arith.constant 0.000000e+00 : f32
    %6 = vector.broadcast %cst_5 : f32 to vector<8x32xf32>
    %7 = arith.maximumf %5, %6 : vector<8x32xf32>
    %c0_6 = arith.constant 0 : index
    %c0_7 = arith.constant 0 : index
    %8 = vector.load %arg4[%c0_6, %c0_7] : memref<32x32xf32, #tpu.memory_space<vmem>>, vector<32x32xf32>
    %cst_8 = arith.constant dense<0.000000e+00> : vector<8x32xf32>
    %9 = tpu.matmul %7, %8, %cst_8 {dimension_numbers = #tpu.dot_dimension_numbers<[1], [0], [0], [1], [0, 0, 1, 1], [], []>} : vector<8x32xf32>, vector<32x32xf32>, vector<8x32xf32> -> vector<8x32xf32>
    %c0_9 = arith.constant 0 : index
    %c0_10 = arith.constant 0 : index
    %10 = vector.load %arg5[%c0_9, %c0_10] : memref<1x32xf32, #tpu.memory_space<vmem>>, vector<1x32xf32>
    %11 = vector.broadcast %10 : vector<1x32xf32> to vector<8x32xf32>
    %12 = arith.addf %9, %11 : vector<8x32xf32>
    %c0_11 = arith.constant 0 : index
    %c0_12 = arith.constant 0 : index
    %13 = vector.load %arg6[%c0_11, %c0_12] : memref<32x12xf32, #tpu.memory_space<vmem>>, vector<32x12xf32>
    %cst_13 = arith.constant dense<0.000000e+00> : vector<8x12xf32>
    %14 = tpu.matmul %12, %13, %cst_13 {dimension_numbers = #tpu.dot_dimension_numbers<[1], [0], [0], [1], [0, 0, 1, 1], [], []>} : vector<8x32xf32>, vector<32x12xf32>, vector<8x12xf32> -> vector<8x12xf32>
    %c0_14 = arith.constant 0 : index
    %c0_15 = arith.constant 0 : index
    %15 = vector.load %arg7[%c0_14, %c0_15] : memref<1x12xf32, #tpu.memory_space<vmem>>, vector<1x12xf32>
    %16 = vector.broadcast %15 : vector<1x12xf32> to vector<8x12xf32>
    %17 = arith.addf %14, %16 : vector<8x12xf32>
    %c0_16 = arith.constant 0 : index
    %c0_17 = arith.constant 0 : index
    %18 = vector.load %arg9[%c0_16, %c0_17] : memref<8x12xf32, #tpu.memory_space<vmem>>, vector<8x12xf32>
    tpu.vector_store %arg9[%c0_16, %c0_17], %17 {strides = array<i32>} : memref<8x12xf32, #tpu.memory_space<vmem>>, vector<8x12xf32>,
    %19 = vector.extract_strided_slice %17 {offsets = [0, 0], sizes = [8, 2], strides = [1, 1]} : vector<8x12xf32> to vector<8x2xf32>
    %20 = vector.extract_strided_slice %17 {offsets = [0, 2], sizes = [8, 10], strides = [1, 1]} : vector<8x12xf32> to vector<8x10xf32>
    %cst_18 = arith.constant dense<0xFF800000> : vector<8xf32>
    %21 = vector.multi_reduction <maximumf>, %19, %cst_18 [1] : vector<8x2xf32> to vector<8xf32>
    %22 = vector.shape_cast %21 : vector<8xf32> to vector<8x1xf32>
    %23 = vector.broadcast %22 : vector<8x1xf32> to vector<8x2xf32>
    %24 = arith.subf %19, %23 : vector<8x2xf32>
    %25 = math.exp %24 : vector<8x2xf32>
    %cst_19 = arith.constant dense<0.000000e+00> : vector<8xf32>
    %26 = vector.multi_reduction <add>, %25, %cst_19 [1] : vector<8x2xf32> to vector<8xf32>
    %27 = vector.shape_cast %26 : vector<8xf32> to vector<8x1xf32>
    %28 = tpu.reciprocal %27 {approx = true} : vector<8x1xf32> -> vector<8x1xf32>
    %29 = vector.broadcast %28 : vector<8x1xf32> to vector<8x2xf32>
    %30 = arith.mulf %25, %29 : vector<8x2xf32>
    %cst_20 = arith.constant dense<0xFF800000> : vector<8xf32>
    %31 = vector.multi_reduction <maximumf>, %20, %cst_20 [1] : vector<8x10xf32> to vector<8xf32>
    %32 = vector.shape_cast %31 : vector<8xf32> to vector<8x1xf32>
    %33 = vector.broadcast %32 : vector<8x1xf32> to vector<8x10xf32>
    %34 = arith.subf %20, %33 : vector<8x10xf32>
    %35 = math.exp %34 : vector<8x10xf32>
    %cst_21 = arith.constant dense<0.000000e+00> : vector<8xf32>
    %36 = vector.multi_reduction <add>, %35, %cst_21 [1] : vector<8x10xf32> to vector<8xf32>
    %37 = vector.shape_cast %36 : vector<8xf32> to vector<8x1xf32>
    %38 = tpu.reciprocal %37 {approx = true} : vector<8x1xf32> -> vector<8x1xf32>
    %39 = vector.broadcast %38 : vector<8x1xf32> to vector<8x10xf32>
    %40 = arith.mulf %35, %39 : vector<8x10xf32>
    %41 = vector.extract_strided_slice %30 {offsets = [0, 0], sizes = [8, 1], strides = [1, 1]} : vector<8x2xf32> to vector<8x1xf32>
    %42 = vector.broadcast %41 : vector<8x1xf32> to vector<8x10xf32>
    %43 = arith.mulf %42, %40 : vector<8x10xf32>
    %c0_22 = arith.constant 0 : index
    %c0_23 = arith.constant 0 : index
    %44 = vector.load %arg8[%c0_22, %c0_23] : memref<8x20xf32, #tpu.memory_space<vmem>>, vector<8x10xf32>
    tpu.vector_store %arg8[%c0_22, %c0_23], %43 {strides = array<i32>} : memref<8x20xf32, #tpu.memory_space<vmem>>, vector<8x10xf32>,
    %45 = vector.extract_strided_slice %30 {offsets = [0, 1], sizes = [8, 1], strides = [1, 1]} : vector<8x2xf32> to vector<8x1xf32>
    %46 = vector.broadcast %45 : vector<8x1xf32> to vector<8x10xf32>
    %47 = arith.mulf %46, %40 : vector<8x10xf32>
    %c0_24 = arith.constant 0 : index
    %c10 = arith.constant 10 : index
    %48 = vector.load %arg8[%c0_24, %c10] : memref<8x20xf32, #tpu.memory_space<vmem>>, vector<8x10xf32>
    tpu.vector_store %arg8[%c0_24, %c10], %47 {strides = array<i32>} : memref<8x20xf32, #tpu.memory_space<vmem>>, vector<8x10xf32>,
    return
  }
  func.func @transform_0(%arg0: i32) -> (i32, i32) {
    %c0_i32 = arith.constant 0 : i32
    %c0_i32_0 = arith.constant 0 : i32
    return %arg0, %c0_i32 : i32, i32
  }
  func.func @transform_1(%arg0: i32) -> (i32, i32) {
    %c0_i32 = arith.constant 0 : i32
    %c0_i32_0 = arith.constant 0 : i32
    %c0_i32_1 = arith.constant 0 : i32
    return %c0_i32, %c0_i32_0 : i32, i32
  }
  func.func @transform_2(%arg0: i32) -> (i32, i32) {
    %c0_i32 = arith.constant 0 : i32
    %c0_i32_0 = arith.constant 0 : i32
    %c0_i32_1 = arith.constant 0 : i32
    return %c0_i32, %c0_i32_0 : i32, i32
  }
  func.func @transform_3(%arg0: i32) -> (i32, i32) {
    %c0_i32 = arith.constant 0 : i32
    %c0_i32_0 = arith.constant 0 : i32
    %c0_i32_1 = arith.constant 0 : i32
    return %c0_i32, %c0_i32_0 : i32, i32
  }
  func.func @transform_4(%arg0: i32) -> (i32, i32) {
    %c0_i32 = arith.constant 0 : i32
    %c0_i32_0 = arith.constant 0 : i32
    %c0_i32_1 = arith.constant 0 : i32
    return %c0_i32, %c0_i32_0 : i32, i32
  }
  func.func @transform_5(%arg0: i32) -> (i32, i32) {
    %c0_i32 = arith.constant 0 : i32
    %c0_i32_0 = arith.constant 0 : i32
    %c0_i32_1 = arith.constant 0 : i32
    return %c0_i32, %c0_i32_0 : i32, i32
  }
  func.func @transform_6(%arg0: i32) -> (i32, i32) {
    %c0_i32 = arith.constant 0 : i32
    %c0_i32_0 = arith.constant 0 : i32
    %c0_i32_1 = arith.constant 0 : i32
    return %c0_i32, %c0_i32_0 : i32, i32
  }
  func.func @transform_7(%arg0: i32) -> (i32, i32) {
    %c0_i32 = arith.constant 0 : i32
    %c0_i32_0 = arith.constant 0 : i32
    return %arg0, %c0_i32 : i32, i32
  }
  func.func @transform_8(%arg0: i32) -> (i32, i32) {
    %c0_i32 = arith.constant 0 : i32
    %c0_i32_0 = arith.constant 0 : i32
    return %arg0, %c0_i32 : i32, i32
  }
}

</mosaic_0001>

<bundles_post_ra>
// kernel: factorized_forward.1
= control target key start
LH: loop header
LB: loop body
LE: loop exit
PB: predicated region body
PF: predicated region fallthrough
CT: control target
= control target key end

     0   :  { %vm1018_vm0 = vmmov 0   ;;  %vm463_vm1 = vcmask 261120   ;;  %vm621_vm2 = vcmask 97280   ;;  %vm623_vm3 = vcmask 15360   ;;  %s1523_s1 = inlined_call_operand.vmem [shape: f32[1024,32], index: 1, kind: input, shape index: {}]   ;;  %s1524_s0 = inlined_call_operand.vmem [shape: f32[8,1024], index: 0, kind: input, shape index: {}]   ;;  %s1525_s3 = inlined_call_operand.vmem [shape: f32[32,32], index: 3, kind: input, shape index: {}]   ;;  %s1526_s5 = inlined_call_operand.vmem [shape: f32[32,12], index: 5, kind: input, shape index: {}]   ;;  %s1527_s2 = inlined_call_operand.vmem [shape: f32[1,32], index: 2, kind: input, shape index: {}]   ;;  %s1528_s4 = inlined_call_operand.vmem [shape: f32[1,32], index: 4, kind: input, shape index: {}]   ;;  %s1529_s6 = inlined_call_operand.vmem [shape: f32[1,12], index: 6, kind: input, shape index: {}]   ;;  %s1530_s8 = inlined_call_operand.vmem [shape: f32[8,12], index: 8, kind: output, shape index: {1}]   ;;  %s1531_s7 = inlined_call_operand.vmem [shape: f32[8,20], index: 7, kind: output, shape index: {0}]  }
   0x1   :  { %v52_v0 = vld [vmem:[%s1523_s1 + $0x80] sm:$0xff]  ;;  %v53_v1 = vld [vmem:[%s1523_s1 + $0x88] sm:$0xff]  ;;  %v54_v11 = vld [vmem:[%s1523_s1 + $0x90] sm:$0xff]  ;;  %vm635_vm4 = vcmask 97296   ;;  %vm646_vm5 = vcmask 80896   ;;  %vm672_vm6 = vcmask 162896  }
   0x2   :  { %v36_v2 = vld [vmem:[%s1523_s1] sm:$0xff]  ;;  %v859_v3 = vpack.c.bf16 %v53_v1, %v52_v0  ;;  %v37_v4 = vld [vmem:[%s1523_s1 + $0x8] sm:$0xff]  ;;  %v55_v13 = vld [vmem:[%s1523_s1 + $0x98] sm:$0xff] }
   0x3   :  { %v84_v5 = vld [vmem:[%s1523_s1 + $0x180] sm:$0xff]  ;;  %v85_v6 = vld [vmem:[%s1523_s1 + $0x188] sm:$0xff]  ;;  %v861_v7 = vpack.c.bf16 %v37_v4, %v36_v2  ;;  %v38_v14 = vld [vmem:[%s1523_s1 + $0x10] sm:$0xff]  ;;  %v863_v16 = vpack.c.bf16 %v55_v13, %v54_v11 }
   0x4   :  { %v891_v8 = vpack.c.bf16 %v85_v6, %v84_v5  ;;  %v68_v9 = vld [vmem:[%s1523_s1 + $0x100] sm:$0xff]  ;;  %v69_v10 = vld [vmem:[%s1523_s1 + $0x108] sm:$0xff]  ;;  %860 = vmatprep.subr.bf16.mxu0 %v859_v3  ;;  %v39_v15 = vld [vmem:[%s1523_s1 + $0x18] sm:$0xff] }
   0x5   :  { %v893_v12 = vpack.c.bf16 %v69_v10, %v68_v9  ;;  %862 = vmatpush3.bf16.msra.mxu0 %v861_v7  ;;  %v865_v17 = vpack.c.bf16 %v39_v15, %v38_v14  ;;  %v86_v18 = vld [vmem:[%s1523_s1 + $0x190] sm:$0xff]  ;;  %v87_v19 = vld [vmem:[%s1523_s1 + $0x198] sm:$0xff]  ;;  %v56_v23 = vld [vmem:[%s1523_s1 + $0xa0] sm:$0xff] }
   0x6   :  { %892 = vmatprep.subr.bf16.mxu1 %v891_v8  ;;  %v70_v20 = vld [vmem:[%s1523_s1 + $0x110] sm:$0xff]  ;;  %v895_v21 = vpack.c.bf16 %v87_v19, %v86_v18  ;;  %v71_v22 = vld [vmem:[%s1523_s1 + $0x118] sm:$0xff]  ;;  %v57_v24 = vld [vmem:[%s1523_s1 + $0xa8] sm:$0xff]  ;;  %864 = vmatprep.subr.bf16.mxu0 %v863_v16 }
   0x7   :  { %894 = vmatpush3.bf16.msra.mxu1 %v893_v12  ;;  %v897_v25 = vpack.c.bf16 %v71_v22, %v70_v20  ;;  %v867_v26 = vpack.c.bf16 %v57_v24, %v56_v23  ;;  %v40_v27 = vld [vmem:[%s1523_s1 + $0x20] sm:$0xff]  ;;  %v41_v28 = vld [vmem:[%s1523_s1 + $0x28] sm:$0xff]  ;;  %v58_v35 = vld [vmem:[%s1523_s1 + $0xb0] sm:$0xff] }
   0x8   :  { %v88_v29 = vld [vmem:[%s1523_s1 + $0x1a0] sm:$0xff]  ;;  %896 = vmatprep.subr.bf16.mxu1 %v895_v21  ;;  %v89_v30 = vld [vmem:[%s1523_s1 + $0x1a8] sm:$0xff]  ;;  %v869_v33 = vpack.c.bf16 %v41_v28, %v40_v27  ;;  %v59_v36 = vld [vmem:[%s1523_s1 + $0xb8] sm:$0xff] }
   0x9   :  { %v72_v31 = vld [vmem:[%s1523_s1 + $0x120] sm:$0xff]  ;;  %v73_v32 = vld [vmem:[%s1523_s1 + $0x128] sm:$0xff]  ;;  %866 = vmatpush3.bf16.msra.mxu0 %v865_v17  ;;  %v899_v34 = vpack.c.bf16 %v89_v30, %v88_v29  ;;  %v42_v37 = vld [vmem:[%s1523_s1 + $0x30] sm:$0xff]  ;;  %v871_v39 = vpack.c.bf16 %v59_v36, %v58_v35 }
   0xa   :  { %868 = vmatprep.subr.bf16.mxu0 %v867_v26  ;;  %v901_v38 = vpack.c.bf16 %v73_v32, %v72_v31  ;;  %v43_v40 = vld [vmem:[%s1523_s1 + $0x38] sm:$0xff]  ;;  %v90_v41 = vld [vmem:[%s1523_s1 + $0x1b0] sm:$0xff]  ;;  %v60_v46 = vld [vmem:[%s1523_s1 + $0xc0] sm:$0xff] }
   0xb   :  { %898 = vmatpush3.bf16.msra.mxu1 %v897_v25  ;;  %v91_v42 = vld [vmem:[%s1523_s1 + $0x1b8] sm:$0xff]  ;;  %v74_v44 = vld [vmem:[%s1523_s1 + $0x130] sm:$0xff]  ;;  %v61_v47 = vld [vmem:[%s1523_s1 + $0xc8] sm:$0xff]  ;;  %v873_v48 = vpack.c.bf16 %v43_v40, %v42_v37 }
   0xc   :  { %900 = vmatprep.subr.bf16.mxu1 %v899_v34  ;;  %v903_v43 = vpack.c.bf16 %v91_v42, %v90_v41  ;;  %v75_v45 = vld [vmem:[%s1523_s1 + $0x138] sm:$0xff]  ;;  %v92_v49 = vld [vmem:[%s1523_s1 + $0x1c0] sm:$0xff]  ;;  %v93_v50 = vld [vmem:[%s1523_s1 + $0x1c8] sm:$0xff]  ;;  %v875_v52 = vpack.c.bf16 %v61_v47, %v60_v46 }
   0xd   :  { %870 = vmatpush3.bf16.msra.mxu0 %v869_v33  ;;  %v905_v51 = vpack.c.bf16 %v75_v45, %v74_v44  ;;  %v44_v53 = vld [vmem:[%s1523_s1 + $0x40] sm:$0xff]  ;;  %v45_v54 = vld [vmem:[%s1523_s1 + $0x48] sm:$0xff]  ;;  %v907_v56 = vpack.c.bf16 %v93_v50, %v92_v49  ;;  %v62_v58 = vld [vmem:[%s1523_s1 + $0xd0] sm:$0xff] }
   0xe   :  { %872 = vmatprep.subr.bf16.mxu0 %v871_v39  ;;  %v76_v55 = vld [vmem:[%s1523_s1 + $0x140] sm:$0xff]  ;;  %v77_v57 = vld [vmem:[%s1523_s1 + $0x148] sm:$0xff]  ;;  %v63_v59 = vld [vmem:[%s1523_s1 + $0xd8] sm:$0xff]  ;;  %v877_v62 = vpack.c.bf16 %v45_v54, %v44_v53 }
   0xf   :  { %902 = vmatpush3.bf16.msra.mxu1 %v901_v38  ;;  %v94_v60 = vld [vmem:[%s1523_s1 + $0x1d0] sm:$0xff]  ;;  %v95_v61 = vld [vmem:[%s1523_s1 + $0x1d8] sm:$0xff]  ;;  %v909_v63 = vpack.c.bf16 %v77_v57, %v76_v55  ;;  %v879_v0 = vpack.c.bf16 %v63_v59, %v62_v58  ;;  %v64_v6 = vld [vmem:[%s1523_s1 + $0xe0] sm:$0xff] }
  0x10   :  { %904 = vmatprep.subr.bf16.mxu1 %v903_v43  ;;  %v46_v1 = vld [vmem:[%s1523_s1 + $0x50] sm:$0xff]  ;;  %v47_v2 = vld [vmem:[%s1523_s1 + $0x58] sm:$0xff]  ;;  %v911_v4 = vpack.c.bf16 %v95_v61, %v94_v60  ;;  %v65_v7 = vld [vmem:[%s1523_s1 + $0xe8] sm:$0xff] }
  0x11   :  { %874 = vmatpush3.bf16.msra.mxu0 %v873_v48  ;;  %v78_v3 = vld [vmem:[%s1523_s1 + $0x150] sm:$0xff]  ;;  %v79_v5 = vld [vmem:[%s1523_s1 + $0x158] sm:$0xff]  ;;  %v96_v8 = vld [vmem:[%s1523_s1 + $0x1e0] sm:$0xff]  ;;  %v881_v10 = vpack.c.bf16 %v47_v2, %v46_v1  ;;  %v883_v14 = vpack.c.bf16 %v65_v7, %v64_v6 }
  0x12   :  { %876 = vmatprep.subr.bf16.mxu0 %v875_v52  ;;  %v97_v9 = vld [vmem:[%s1523_s1 + $0x1e8] sm:$0xff]  ;;  %v48_v11 = vld [vmem:[%s1523_s1 + $0x60] sm:$0xff]  ;;  %v913_v13 = vpack.c.bf16 %v79_v5, %v78_v3  ;;  %v66_v19 = vld [vmem:[%s1523_s1 + $0xf0] sm:$0xff] }
  0x13   :  { %906 = vmatpush3.bf16.msra.mxu1 %v905_v51  ;;  %v49_v12 = vld [vmem:[%s1523_s1 + $0x68] sm:$0xff]  ;;  %v80_v15 = vld [vmem:[%s1523_s1 + $0x160] sm:$0xff]  ;;  %v915_v18 = vpack.c.bf16 %v97_v9, %v96_v8  ;;  %v67_v20 = vld [vmem:[%s1523_s1 + $0xf8] sm:$0xff] }
  0x14   :  { %908 = vmatprep.subr.bf16.mxu1 %v907_v56  ;;  %v81_v16 = vld [vmem:[%s1523_s1 + $0x168] sm:$0xff]  ;;  %v31_v21 = vld [vmem:[%s1524_s0 + $0x18] sm:$0xff]  ;;  %v98_v22 = vld [vmem:[%s1523_s1 + $0x1f0] sm:$0xff]  ;;  %v885_v24 = vpack.c.bf16 %v49_v12, %v48_v11  ;;  %v887_v26 = vpack.c.bf16 %v67_v20, %v66_v19 }
  0x15   :  { %878 = vmatpush3.bf16.msra.mxu0 %v877_v62  ;;  %v29_v17 = vld [vmem:[%s1524_s0 + $0x8] sm:$0xff]  ;;  %v99_v23 = vld [vmem:[%s1523_s1 + $0x1f8] sm:$0xff]  ;;  %305 = vmatprep.mubr.f32.mxu1 %v31_v21  ;;  %v917_v25 = vpack.c.bf16 %v81_v16, %v80_v15  ;;  %v50_v27 = vld [vmem:[%s1523_s1 + $0x70] sm:$0xff] }
  0x16   :  { %880 = vmatprep.subr.bf16.mxu0 %v879_v0  ;;  %235 = vmatprep.mubr.f32.mxu0 %v29_v17  ;;  %v51_v28 = vld [vmem:[%s1523_s1 + $0x78] sm:$0xff]  ;;  %v82_v29 = vld [vmem:[%s1523_s1 + $0x170] sm:$0xff]  ;;  %v919_v30 = vpack.c.bf16 %v99_v23, %v98_v22  ;;  %v116_v32 = vld [vmem:[%s1523_s1 + $0x280] sm:$0xff] }
  0x17   :  { %910 = vmatpush3.bf16.msra.mxu1 %v909_v63  ;;  %v83_v31 = vld [vmem:[%s1523_s1 + $0x178] sm:$0xff]  ;;  %v117_v33 = vld [vmem:[%s1523_s1 + $0x288] sm:$0xff]  ;;  %v148_v34 = vld [vmem:[%s1523_s1 + $0x380] sm:$0xff]  ;;  %v889_v36 = vpack.c.bf16 %v51_v28, %v50_v27 }
  0x18   :  { %912 = vmatprep.subr.bf16.mxu1 %v911_v4  ;;  %v149_v35 = vld [vmem:[%s1523_s1 + $0x388] sm:$0xff]  ;;  %v921_v37 = vpack.c.bf16 %v83_v31, %v82_v29  ;;  %v923_v38 = vpack.c.bf16 %v117_v33, %v116_v32  ;;  %v100_v39 = vld [vmem:[%s1523_s1 + $0x200] sm:$0xff]  ;;  %v118_v44 = vld [vmem:[%s1523_s1 + $0x290] sm:$0xff] }
  0x19   :  { %882 = vmatpush3.bf16.msra.mxu0 %v881_v10  ;;  %v101_v40 = vld [vmem:[%s1523_s1 + $0x208] sm:$0xff]  ;;  %v132_v41 = vld [vmem:[%s1523_s1 + $0x300] sm:$0xff]  ;;  %v955_v42 = vpack.c.bf16 %v149_v35, %v148_v34  ;;  %v119_v45 = vld [vmem:[%s1523_s1 + $0x298] sm:$0xff] }
  0x1a   :  { %884 = vmatprep.subr.bf16.mxu0 %v883_v14  ;;  %v133_v43 = vld [vmem:[%s1523_s1 + $0x308] sm:$0xff]  ;;  %v150_v46 = vld [vmem:[%s1523_s1 + $0x390] sm:$0xff]  ;;  %v151_v47 = vld [vmem:[%s1523_s1 + $0x398] sm:$0xff]  ;;  %v925_v49 = vpack.c.bf16 %v101_v40, %v100_v39  ;;  %v927_v52 = vpack.c.bf16 %v119_v45, %v118_v44 }
  0x1b   :  { %914 = vmatpush3.bf16.msra.mxu1 %v913_v13  ;;  %v28_v48 = vld [vmem:[%s1524_s0] sm:$0xff]  ;;  %v30_v50 = vld [vmem:[%s1524_s0 + $0x10] sm:$0xff]  ;;  %v957_v51 = vpack.c.bf16 %v133_v43, %v132_v41  ;;  %v103_v54 = vld [vmem:[%s1523_s1 + $0x218] sm:$0xff]  ;;  %v959_v56 = vpack.c.bf16 %v151_v47, %v150_v46 }
  0x1c   :  { %916 = vmatprep.subr.bf16.mxu1 %v915_v18  ;;  %v102_v53 = vld [vmem:[%s1523_s1 + $0x210] sm:$0xff]  ;;  %v135_v57 = vld [vmem:[%s1523_s1 + $0x318] sm:$0xff]  ;;  %v120_v58 = vld [vmem:[%s1523_s1 + $0x2a0] sm:$0xff] }
  0x1d   :  { %886 = vmatpush3.bf16.msra.mxu0 %v885_v24  ;;  %v134_v55 = vld [vmem:[%s1523_s1 + $0x310] sm:$0xff]  ;;  %v121_v59 = vld [vmem:[%s1523_s1 + $0x2a8] sm:$0xff]  ;;  %v152_v60 = vld [vmem:[%s1523_s1 + $0x3a0] sm:$0xff]  ;;  %v929_v62 = vpack.c.bf16 %v103_v54, %v102_v53 }
  0x1e   :  { %888 = vmatprep.subr.bf16.mxu0 %v887_v26  ;;  %v153_v61 = vld [vmem:[%s1523_s1 + $0x3a8] sm:$0xff]  ;;  %v961_v63 = vpack.c.bf16 %v135_v57, %v134_v55  ;;  %v931_v0 = vpack.c.bf16 %v121_v59, %v120_v58  ;;  %v104_v1 = vld [vmem:[%s1523_s1 + $0x220] sm:$0xff]  ;;  %v122_v6 = vld [vmem:[%s1523_s1 + $0x2b0] sm:$0xff] }
  0x1f   :  { %918 = vmatpush3.bf16.msra.mxu1 %v917_v25  ;;  %v105_v2 = vld [vmem:[%s1523_s1 + $0x228] sm:$0xff]  ;;  %v136_v3 = vld [vmem:[%s1523_s1 + $0x320] sm:$0xff]  ;;  %v963_v4 = vpack.c.bf16 %v153_v61, %v152_v60  ;;  %v123_v7 = vld [vmem:[%s1523_s1 + $0x2b8] sm:$0xff] }
  0x20   :  { %920 = vmatprep.subr.bf16.mxu1 %v919_v30  ;;  %v137_v5 = vld [vmem:[%s1523_s1 + $0x328] sm:$0xff]  ;;  %v154_v8 = vld [vmem:[%s1523_s1 + $0x3b0] sm:$0xff]  ;;  %v155_v9 = vld [vmem:[%s1523_s1 + $0x3b8] sm:$0xff]  ;;  %v933_v10 = vpack.c.bf16 %v105_v2, %v104_v1  ;;  %v935_v12 = vpack.c.bf16 %v123_v7, %v122_v6 }
  0x21   :  { %890 = vmatpush3.bf16.msra.mxu0 %v889_v36  ;;  %v965_v11 = vpack.c.bf16 %v137_v5, %v136_v3  ;;  %v106_v13 = vld [vmem:[%s1523_s1 + $0x230] sm:$0xff]  ;;  %v107_v14 = vld [vmem:[%s1523_s1 + $0x238] sm:$0xff]  ;;  %v967_v16 = vpack.c.bf16 %v155_v9, %v154_v8  ;;  %v124_v18 = vld [vmem:[%s1523_s1 + $0x2c0] sm:$0xff] }
  0x22   :  { %924 = vmatprep.subr.bf16.mxu0 %v923_v38  ;;  %v138_v15 = vld [vmem:[%s1523_s1 + $0x330] sm:$0xff]  ;;  %v139_v17 = vld [vmem:[%s1523_s1 + $0x338] sm:$0xff]  ;;  %v125_v19 = vld [vmem:[%s1523_s1 + $0x2c8] sm:$0xff]  ;;  %v937_v22 = vpack.c.bf16 %v107_v14, %v106_v13 }
  0x23   :  { %922 = vmatpush3.bf16.msra.mxu1 %v921_v37  ;;  %v156_v20 = vld [vmem:[%s1523_s1 + $0x3c0] sm:$0xff]  ;;  %v157_v21 = vld [vmem:[%s1523_s1 + $0x3c8] sm:$0xff]  ;;  %v35_v24 = vld [vmem:[%s1524_s0 + $0x38] sm:$0xff]  ;;  %v969_v25 = vpack.c.bf16 %v139_v17, %v138_v15  ;;  %v939_v26 = vpack.c.bf16 %v125_v19, %v124_v18  ;;  %v1019_v15 = vmov 0.0  }
  0x24   :  { %956 = vmatprep.subr.bf16.mxu1 %v955_v42  ;;  %236 = vmatmul.mubr.f32.vlgmr.msra.gmra.mrb[0].mxu0 %v28_v48  ;;  %v33_v23 = vld [vmem:[%s1524_s0 + $0x28] sm:$0xff]  ;;  %v108_v27 = vld [vmem:[%s1523_s1 + $0x240] sm:$0xff]  ;;  %v971_v30 = vpack.c.bf16 %v157_v21, %v156_v20  ;;  %v126_v32 = vld [vmem:[%s1523_s1 + $0x2d0] sm:$0xff] }
  0x25   :  { %926 = vmatpush3.bf16.msra.mxu0 %v925_v49  ;;  %v109_v28 = vld [vmem:[%s1523_s1 + $0x248] sm:$0xff]  ;;  %v140_v29 = vld [vmem:[%s1523_s1 + $0x340] sm:$0xff]  ;;  %v127_v33 = vld [vmem:[%s1523_s1 + $0x2d8] sm:$0xff]  ;;  %375 = vmatprep.mubr.f32.mxu0 %v33_v23 }
  0x26   :  { %306 = vmatmul.mubr.f32.vlgmr.msra.gmra.mrb[0].mxu1 %v30_v50  ;;  %928 = vmatprep.subr.bf16.mxu0 %v927_v52  ;;  %v141_v31 = vld [vmem:[%s1523_s1 + $0x348] sm:$0xff]  ;;  %v158_v34 = vld [vmem:[%s1523_s1 + $0x3d0] sm:$0xff]  ;;  %v159_v35 = vld [vmem:[%s1523_s1 + $0x3d8] sm:$0xff]  ;;  %v941_v36 = vpack.c.bf16 %v109_v28, %v108_v27  ;;  %v943_v38 = vpack.c.bf16 %v127_v33, %v126_v32 }
  0x27   :  { %958 = vmatpush3.bf16.msra.mxu1 %v957_v51  ;;  %445 = vmatprep.mubr.f32.mxu1 %v35_v24  ;;  %v973_v37 = vpack.c.bf16 %v141_v31, %v140_v29  ;;  %v110_v39 = vld [vmem:[%s1523_s1 + $0x250] sm:$0xff]  ;;  %v111_v40 = vld [vmem:[%s1523_s1 + $0x258] sm:$0xff]  ;;  %v975_v42 = vpack.c.bf16 %v159_v35, %v158_v34  ;;  %v128_v44 = vld [vmem:[%s1523_s1 + $0x2e0] sm:$0xff] }
  0x28   :  { %960 = vmatprep.subr.bf16.mxu1 %v959_v56  ;;  %v142_v41 = vld [vmem:[%s1523_s1 + $0x350] sm:$0xff]  ;;  %v143_v43 = vld [vmem:[%s1523_s1 + $0x358] sm:$0xff]  ;;  %v129_v45 = vld [vmem:[%s1523_s1 + $0x2e8] sm:$0xff]  ;;  %v945_v48 = vpack.c.bf16 %v111_v40, %v110_v39 }
  0x29   :  { %930 = vmatpush3.bf16.msra.mxu0 %v929_v62  ;;  %v160_v46 = vld [vmem:[%s1523_s1 + $0x3e0] sm:$0xff]  ;;  %v161_v47 = vld [vmem:[%s1523_s1 + $0x3e8] sm:$0xff]  ;;  %v977_v49 = vpack.c.bf16 %v143_v43, %v142_v41  ;;  %v947_v50 = vpack.c.bf16 %v129_v45, %v128_v44  ;;  %v130_v56 = vld [vmem:[%s1523_s1 + $0x2f0] sm:$0xff] }
  0x2a   :  { %932 = vmatprep.subr.bf16.mxu0 %v931_v0  ;;  %v112_v51 = vld [vmem:[%s1523_s1 + $0x260] sm:$0xff]  ;;  %v113_v52 = vld [vmem:[%s1523_s1 + $0x268] sm:$0xff]  ;;  %v979_v54 = vpack.c.bf16 %v161_v47, %v160_v46  ;;  %v131_v57 = vld [vmem:[%s1523_s1 + $0x2f8] sm:$0xff] }
  0x2b   :  { %962 = vmatpush3.bf16.msra.mxu1 %v961_v63  ;;  %v144_v53 = vld [vmem:[%s1523_s1 + $0x360] sm:$0xff]  ;;  %v145_v55 = vld [vmem:[%s1523_s1 + $0x368] sm:$0xff]  ;;  %v162_v58 = vld [vmem:[%s1523_s1 + $0x3f0] sm:$0xff]  ;;  %v949_v60 = vpack.c.bf16 %v113_v52, %v112_v51  ;;  %v951_v62 = vpack.c.bf16 %v131_v57, %v130_v56 }
  0x2c   :  { %964 = vmatprep.subr.bf16.mxu1 %v963_v4  ;;  %v163_v59 = vld [vmem:[%s1523_s1 + $0x3f8] sm:$0xff]  ;;  %v981_v61 = vpack.c.bf16 %v145_v55, %v144_v53  ;;  %v114_v63 = vld [vmem:[%s1523_s1 + $0x270] sm:$0xff]  ;;  %v32_v6 = vld [vmem:[%s1524_s0 + $0x20] sm:$0xff] }
  0x2d   :  { %934 = vmatpush3.bf16.msra.mxu0 %v933_v10  ;;  %v115_v0 = vld [vmem:[%s1523_s1 + $0x278] sm:$0xff]  ;;  %v983_v1 = vpack.c.bf16 %v163_v59, %v162_v58  ;;  %v146_v2 = vld [vmem:[%s1523_s1 + $0x370] sm:$0xff]  ;;  %v452_v8 = vld [vmem:[%s1525_s3] sm:$0xff]  ;;  %v1021_v59 = vmov 1  }
  0x2e   :  { %936 = vmatprep.subr.bf16.mxu0 %v935_v12  ;;  %v147_v3 = vld [vmem:[%s1523_s1 + $0x378] sm:$0xff]  ;;  %v953_v4 = vpack.c.bf16 %v115_v0, %v114_v63  ;;  %v34_v7 = vld [vmem:[%s1524_s0 + $0x30] sm:$0xff]  ;;  %v453_v9 = vld [vmem:[%s1525_s3 + $0x8] sm:$0xff]  ;;  %1007 = vset.pattern.permute.xlu1 %v1021_v59 }
  0x2f   :  { %966 = vmatpush3.bf16.msra.mxu1 %v965_v11  ;;  %v985_v5 = vpack.c.bf16 %v147_v3, %v146_v2  ;;  %v988_v10 = vpack.c.bf16 %v453_v9, %v452_v8  ;;  %v1017_v11 = vmov 0.0|0.0   ;;  %v454_v12 = vld [vmem:[%s1525_s3 + $0x10] sm:$0xff]  ;;  %v455_v13 = vld [vmem:[%s1525_s3 + $0x18] sm:$0xff]  ;;  %v538_v17 = vld [vmem:[%s1526_s5 + $0x8] sm:$0xff] }
  0x30   :  { %968 = vmatprep.subr.bf16.mxu1 %v967_v16  ;;  %v991_v14 = vpack.c.bf16 %v455_v13, %v454_v12  ;;  %v537_v16 = vld [vmem:[%s1526_s5] sm:$0xff] }
  0x31   :  { %938 = vmatpush3.bf16.msra.mxu0 %v937_v22  ;;  %v994_v18 = vpack.c.bf16 %v538_v17, %v537_v16  ;;  %v682_v20 = vld [vmem:[%s1527_s2] ss:$0 sm:$0xff] }
  0x32   :  { %940 = vmatprep.subr.bf16.mxu0 %v939_v26  ;;  %v683_v40 = vld [vmem:[%s1528_s4] ss:$0 sm:$0xff]  ;;  %s1020_s4 = smov 126  }
  0x33   :  { %970 = vmatpush3.bf16.msra.mxu1 %v969_v25  ;;  %v685_v44 = vld [vmem:[%s1529_s6] ss:$0 sm:$0xff]  ;;  %s1023_s6 = smov 8  }
  0x34   :  { %972 = vmatprep.subr.bf16.mxu1 %v971_v30 }
  0x35   :  { %942 = vmatpush3.bf16.msra.mxu0 %v941_v36 }
  0x36   :  { %944 = vmatprep.subr.bf16.mxu0 %v943_v38  ;;  %v540_v38 = vld [vmem:[%s1526_s5 + $0x18] sm:$0xff] }
  0x37   :  { %974 = vmatpush3.bf16.msra.mxu1 %v973_v37  ;;  %v539_v37 = vld [vmem:[%s1526_s5 + $0x10] sm:$0xff] }
  0x38   :  { %976 = vmatprep.subr.bf16.mxu1 %v975_v42  ;;  %v997_v39 = vpack.c.bf16 %v540_v38, %v539_v37 }
  0x39   :  { %946 = vmatpush3.bf16.msra.mxu0 %v945_v48 }
  0x3a   :  { %948 = vmatprep.subr.bf16.mxu0 %v947_v50 }
  0x3b   :  { %978 = vmatpush3.bf16.msra.mxu1 %v977_v49 }
  0x3c   :  { %980 = vmatprep.subr.bf16.mxu1 %v979_v54 }
  0x3d   :  { %950 = vmatpush3.bf16.msra.mxu0 %v949_v60  ;;  %v1022_v60 = vmov 0  }
  0x3e   :  { %952 = vmatprep.subr.bf16.mxu0 %v951_v62  ;;  %1006 = vset.pattern.permute.xlu0 %v1022_v60 }
  0x3f   :  { %982 = vmatpush3.bf16.msra.mxu1 %v981_v61 }
  0x40   :  { %984 = vmatprep.subr.bf16.mxu1 %v983_v1 }
  0x41   :  { %954 = vmatpush3.bf16.msra.mxu0 %v953_v4 }
  0x42   :  { %987 = vmatprep.subr.bf16.mxu0 %v1017_v11 }
  0x43   :  { %986 = vmatpush3.bf16.msra.mxu1 %v985_v5 }
  0x44   :  { %376 = vmatmul.mubr.f32.vlgmr.msra.gmra.mrb[2].mxu0 %v32_v6  ;;  %993 = vmatprep.subr.bf16.mxu1 %v1017_v11 }
  0x45   :  { %989 = vmatpush3.bf16.msra.mxu0 %v988_v10  ;;  %845 = vmatprep.mubr.msk.f32.mxu0 %vm1018_vm0, %v1019_v15 }
  0x46   :  { %446 = vmatmul.mubr.f32.vlgmr.msra.gmra.mrb[2].mxu1 %v34_v7  ;;  %990 = vmatprep.subr.bf16.mxu0 %v1017_v11 }
  0x47   :  { %856 = vmatprep.mubr.msk.f32.mxu1 %vm1018_vm0, %v1019_v15  ;;  %995 = vmatpush3.bf16.msra.mxu1 %v994_v18 }
  0x48   :  { %996 = vmatprep.subr.bf16.mxu1 %v1017_v11 }
  0x49   :  { %992 = vmatpush3.bf16.msra.mxu0 %v991_v14 }
  0x4b   :  { %998 = vmatpush3.bf16.msra.mxu1 %v997_v39 }
  0xf7   :  { %v719_v19 = vpop.f32.mrb[0].mxu0 }
  0xf8   :  { %v720_v21 = vpop.f32.mrb[1].mxu0 }
  0xf9   :  { %v754_v22 = vpop.f32.mrb[0].mxu1  ;;  %v721_v23 = vadd.f32 %v720_v21, %v719_v19 }
  0xfa   :  { %v755_v24 = vpop.f32.mrb[1].mxu1 }
  0xfb   :  { %v756_v25 = vadd.f32 %v755_v24, %v754_v22  ;;  %v238_v26 = vadd.f32 %v721_v23, %v682_v20 }
  0xfd   :  { %v308_v27 = vadd.f32 %v756_v25, %v238_v26 }
 0x117   :  { %v789_v28 = vpop.f32.mrb[2].mxu0 }
 0x118   :  { %v790_v29 = vpop.f32.mrb[3].mxu0 }
 0x119   :  { %v824_v30 = vpop.f32.mrb[2].mxu1  ;;  %v791_v31 = vadd.f32 %v790_v29, %v789_v28 }
 0x11a   :  { %v825_v32 = vpop.f32.mrb[3].mxu1 }
 0x11b   :  { %v826_v33 = vadd.f32 %v825_v32, %v824_v30  ;;  %v378_v34 = vadd.f32 %v791_v31, %v308_v27 }
 0x11d   :  { %v448_v35 = vadd.f32 %v826_v33, %v378_v34 }
 0x11f   :  { %v451_v36 = vmax.f32 %v448_v35, 0.0 }
 0x121   :  { %846 = vmatmul.mubr.msk.f32.vlgmr.msra.gmra.mrb[4].mxu0 %vm463_vm1, %v451_v36 }
 0x1f4   :  { %v533_v41 = vpop.f32.mrb[4].mxu0 }
 0x1f5   :  { %v534_v42 = vadd.f32 %v683_v40, %v533_v41  ;;  %v847_v43 = vpop.f32.mrb[5].mxu0 }
 0x1f7   :  { %857 = vmatmul.mubr.msk.f32.vlgmr.msra.gmra.mrb[4].mxu1 %vm463_vm1, %v534_v42 }
 0x2ca   :  { %v617_v45 = vpop.f32.mrb[4].mxu1 }
 0x2cb   :  { %v618_v46 = vadd.f32 %v685_v44, %v617_v45  ;;  %v858_v47 = vpop.f32.mrb[5].mxu1 }
 0x2cd   :  { %622 = vst.msk [vmem:[%s1530_s8] sm:$0xff] %vm621_vm2, %v618_v46  ;;  %v624_v48 = vsel %vm623_vm3, %v618_v46, -inf  ;;  %v636_v49 = vsel %vm635_vm4, %v618_v46, -inf }
 0x2ce   :  { %625 = vmax.xlane.f32.xlu0 %v624_v48 }
 0x2d2   :  { %637 = vmax.xlane.f32.xlu0 %v636_v49 }
 0x35b   :  { %v626_v50 = vpop.xlane.xlu0 %625 }
 0x35c   :  { %v627_v51 = vsub.f32 %v618_v46, %v626_v50 }
 0x35e   :  { %v628_v52 = vmul.f32 1.442695, %v627_v51 }
 0x35f   :  { %v638_v53 = vpop.xlane.xlu0 %637 }
 0x360   :  { %1009 = vpow2.f32 %v628_v52  ;;  %v639_v55 = vsub.f32 %v618_v46, %v638_v53 }
 0x362   :  { %v640_v57 = vmul.f32 1.442695, %v639_v55 }
 0x364   :  { %1011 = vpow2.f32 %v640_v57 }
 0x36a   :  { %v1010_v54 = vpop.eup %1009 }
 0x36b   :  { %v630_v56 = vsel %vm623_vm3, %v1010_v54, 0.0 }
 0x36c   :  { %631 = vadd.xlane.f32.xlu1 %v630_v56 }
 0x36e   :  { %v1012_v58 = vpop.eup %1011 }
 0x37d   :  { %643 = vrot.lane.b32.xlu1 %v1012_v58, %s1020_s4 }
 0x3f9   :  { %v632_v61 = vpop.xlane.xlu1 %631 }
 0x3fa   :  { %1013 = vrcp.f32 %v632_v61 }
 0x3fd   :  { %v644_v62 = vpop.permute.xlu1 %643 }
 0x3fe   :  { %v647_v63 = vsel %vm646_vm5, %v644_v62, 0.0 }
 0x3ff   :  { %648 = vadd.xlane.f32.xlu0 %v647_v63 }
 0x404   :  { %v1014_v0 = vpop.eup %1013 }
 0x405   :  { %v634_v1 = vmul.f32 %v1014_v0, %v1010_v54 }
 0x407   :  { %664 = vperm.xlu1 %1007, %v634_v1  }
 0x415   :  { %654 = vperm.xlu0 %1006, %v634_v1  }
 0x419   :  { %1008 = vset.pattern.permute.xlu0 %v1021_v59 }
 0x486   :  { %v665_v7 = vpop.permute.xlu1 %664 }
 0x48c   :  { %v649_v2 = vpop.xlane.xlu0 %648 }
 0x48d   :  { %1015 = vrcp.f32 %v649_v2 }
 0x494   :  { %v655_v5 = vpop.permute.xlu0 %654 }
 0x497   :  { %v1016_v3 = vpop.eup %1015 }
 0x498   :  { %v651_v4 = vmul.f32 %v1016_v3, %v1012_v58 }
 0x49a   :  { %v657_v6 = vmul.f32 %v655_v5, %v651_v4  ;;  %v667_v8 = vmul.f32 %v665_v7, %v651_v4 }
 0x49c   :  { %659 = vrot.lane.b32.xlu1 %v657_v6, %s1020_s4 }
 0x4a0   :  { %669 = vrot.lane.b32.xlu1 %v667_v8, %s1023_s6 }
 0x50e   :  { %v660_v9 = vpop.permute.xlu1 %659 }
 0x50f   :  { %662 = vst.msk [vmem:[%s1531_s7] sm:$0xff] %vm646_vm5, %v660_v9 }
 0x512   :  { %v670_v10 = vpop.permute.xlu1 %669 }
 0x513   :  { %673 = vst.msk [vmem:[%s1531_s7] sm:$0xff] %vm672_vm6, %v670_v10 }

</bundles_post_ra>
